<compile_context>
chip_gen: v7x
topology: tpu7x:2x2x1
jax: 0.10.0
libtpu: 0.0.40
codegen_flags: <defaults>
</compile_context>

<pallas_src>
import numpy as np
import jax
import jax.numpy as jnp
from jax.experimental import pallas as pl
from jax.experimental.pallas import tpu as pltpu

# ---- scaled-down Config (keeps the module's structure, small shapes) ----
D = 32          # Config.init_emb_size (scaled down)
C = 8           # Config.channels (scaled down)
K = 5           # Config.kernel_size
PAD = K // 2    # conv padding
E = 64          # num_entities
R = 8           # num_relations
B = 16          # batch size

WIDTH = D + 2 * PAD     # zero-padded conv width                (36)
CAT = 2 * WIDTH         # both input channels concatenated      (72)
CAT_PAD = 128           # lane-dense padded K for the conv matmul
CD = C * D              # fc contraction dim                    (256)
D_PAD = 128             # lane-dense fc-output / scoring contraction dim
E_PAD = 128             # entity dim padded to a lane multiple
TB = B                  # batch tile (whole toy batch; 128/256 at real scale)
TE = 128                # entity tile (1024-2048 at real scale)

assert B % TB == 0 and E_PAD % TE == 0

HIGHEST = jax.lax.Precision.HIGHEST


def convtranse_kernel(xcat_ref, w1_ref, b1_ref, w2_ref, b2_ref, emb_ref, out_ref):
    """conv(=Toeplitz matmul) -> bias+ReLU -> fc matmul -> bias+ReLU -> score -> sigmoid."""
    # Conv1d + bn1 scale as a single MXU matmul: (TB,128)bf16 @ (128,CD)bf16 -> f32
    h = jnp.dot(xcat_ref[...], w1_ref[...], preferred_element_type=jnp.float32)
    h = jnp.maximum(h + b1_ref[...], 0.0)                       # folded bias + ReLU (f32)
    # fc + bn2 scale: (TB,256)bf16 @ (256,D_PAD)bf16 -> f32 (padded columns stay 0)
    y = jnp.dot(h.astype(jnp.bfloat16), w2_ref[...],
                preferred_element_type=jnp.float32)
    y = jnp.maximum(y + b2_ref[...], 0.0)                       # folded bias + ReLU (f32)
    # scores = y @ emb_tile.T without any transpose: contract dim 1 of both operands
    s = jax.lax.dot_general(y.astype(jnp.bfloat16), emb_ref[...],
                            dimension_numbers=(((1,), (1,)), ((), ())),
                            preferred_element_type=jnp.float32)  # (TB, TE)
    # sigmoid = 0.5*tanh(0.5*x)+0.5 : single EUP push, f32 math, bf16 store
    out_ref[...] = (0.5 * jnp.tanh(0.5 * s) + 0.5).astype(out_ref.dtype)


def bn_scale_shift(bn, eps=1e-5):
    gamma, beta, mean, var = bn
    s = gamma / jnp.sqrt(var + eps)
    return s, beta - mean * s


def init_params(key):
    ks = jax.random.split(key, 10)
    p = {}
    p['emb_e'] = (0.1 * jax.random.normal(ks[0], (E, D), jnp.float32)).at[0].set(0.0)
    p['emb_rel'] = (0.1 * jax.random.normal(ks[1], (R, D), jnp.float32)).at[0].set(0.0)
    p['conv_w'] = 0.1 * jax.random.normal(ks[2], (C, 2, K), jnp.float32)
    p['conv_b'] = 0.1 * jax.random.normal(ks[3], (C,), jnp.float32)
    p['fc_w'] = 0.05 * jax.random.normal(ks[4], (D, CD), jnp.float32)
    p['fc_b'] = 0.05 * jax.random.normal(ks[5], (D,), jnp.float32)

    def bn(k, n):
        k1, k2, k3, k4 = jax.random.split(k, 4)
        return (1.0 + 0.1 * jax.random.normal(k1, (n,), jnp.float32),
                0.1 * jax.random.normal(k2, (n,), jnp.float32),
                0.1 * jax.random.normal(k3, (n,), jnp.float32),
                1.0 + 0.1 * jax.random.uniform(k4, (n,), jnp.float32))

    p['bn_init'] = bn(ks[6], D)
    p['bn0'] = bn(ks[7], 2)
    p['bn1'] = bn(ks[8], C)
    p['bn2'] = bn(ks[9], D)
    # 'b' = Parameter(zeros(num_entities)) is unused in the forward pass.
    return p


def _toeplitz_conv_weight(conv_w_scaled):
    """Banded matrix T (CAT_PAD, CD) s.t. xcat @ T == Conv1d(x) flattened as c*D+d."""
    c_i, ic_i, k_i, d_i = np.meshgrid(np.arange(C), np.arange(2), np.arange(K),
                                      np.arange(D), indexing='ij')
    rows = (ic_i * WIDTH + d_i + k_i).reshape(-1)       # position in the concat slab
    cols = (c_i * D + d_i).reshape(-1)                  # conv output flat index c*D+d
    vals = jnp.broadcast_to(conv_w_scaled[:, :, :, None], (C, 2, K, D)).reshape(-1)
    return jnp.zeros((CAT_PAD, CD), jnp.float32).at[rows, cols].set(vals)


def prepare_model(params, X):
    """Params-only (query-independent) preprocessing, hoisted out of the forward.

    In the PyTorch module X is arange(num_entities) on every call, so all of
    this is per-checkpoint work: compute once and reuse across forward calls.
    """
    emb_initial = params['emb_e'][X]                          # identity gather (E, D)
    si, ti = bn_scale_shift(params['bn_init'])
    e1_embedded_all = emb_initial * si + ti                   # bn_init fold (f32)

    # conv (+ bn1) as one banded matmul weight; conv bias + bn1 shift as bias1
    s1, t1 = bn_scale_shift(params['bn1'])
    w1 = _toeplitz_conv_weight(params['conv_w'] * s1[:, None, None])   # (128, CD)
    b1 = jnp.repeat(params['conv_b'] * s1 + t1, D).reshape(1, CD)

    # fc (+ bn2 scale) weight, zero-padded to D_PAD output columns; bias likewise
    s2, t2 = bn_scale_shift(params['bn2'])
    w2 = jnp.pad(params['fc_w'].T * s2[None, :], ((0, 0), (0, D_PAD - D)))  # (CD, D_PAD)
    b2 = jnp.pad(params['fc_b'] * s2 + t2, (0, D_PAD - D)).reshape(1, D_PAD)

    # entity table, row-major (no transpose), zero-padded to (E_PAD, D_PAD)
    emb_pad = jnp.pad(e1_embedded_all, ((0, E_PAD - E), (0, D_PAD - D)))

    return {
        'e1_embedded_all': e1_embedded_all,                   # f32, for the e1 gather
        'emb_rel': params['emb_rel'],
        's0t0': bn_scale_shift(params['bn0']),
        'w1': w1.astype(jnp.bfloat16),
        'b1': b1,
        'w2': w2.astype(jnp.bfloat16),
        'b2': b2,
        'emb': emb_pad.astype(jnp.bfloat16),                  # streamed entity tiles
    }


def conv_transe_forward(prep, e1, rel):
    """Per-query forward: gather + bn0 + pad in the wrapper, everything heavy in Pallas."""
    e1_embedded = prep['e1_embedded_all'][e1]                  # (B, 1, D)
    rel_embedded = prep['emb_rel'][rel]                        # (B, 1, D)
    stacked = jnp.concatenate([e1_embedded, rel_embedded], 1)  # (B, 2, D)
    s0, t0 = prep['s0t0']
    x = stacked * s0[None, :, None] + t0[None, :, None]        # bn0 (+ identity inp_drop)

    # zero-pad conv width, concat the two channels on the lane axis, pad to 128 lanes
    xp = jnp.pad(x, ((0, 0), (0, 0), (PAD, PAD)))              # (B, 2, WIDTH)
    xcat = jnp.pad(xp.reshape(B, CAT), ((0, 0), (0, CAT_PAD - CAT)))   # (B, 128)
    xcat_b = xcat.astype(jnp.bfloat16)

    out = pl.pallas_call(
        convtranse_kernel,
        out_shape=jax.ShapeDtypeStruct((B, E_PAD), jnp.bfloat16),
        grid=(B // TB, E_PAD // TE),
        in_specs=[
            pl.BlockSpec((TB, CAT_PAD), lambda b, e: (b, 0)),   # xcat        (bf16)
            pl.BlockSpec((CAT_PAD, CD), lambda b, e: (0, 0)),   # Toeplitz conv weight
            pl.BlockSpec((1, CD), lambda b, e: (0, 0)),         # folded conv/bn1 bias
            pl.BlockSpec((CD, D_PAD), lambda b, e: (0, 0)),     # folded fc/bn2 weight
            pl.BlockSpec((1, D_PAD), lambda b, e: (0, 0)),      # folded fc/bn2 bias
            pl.BlockSpec((TE, D_PAD), lambda b, e: (e, 0)),     # entity-table tile
        ],
        out_specs=pl.BlockSpec((TB, TE), lambda b, e: (b, e)),
        compiler_params=pltpu.CompilerParams(
            dimension_semantics=("parallel", "parallel")),
    )(xcat_b, prep['w1'], prep['b1'], prep['w2'], prep['b2'], prep['emb'])
    return out[:, :E]                                           # drop padded entities


def reference_forward(params, e1, rel, X):
    """Pure-JAX f32 reference mirroring the PyTorch forward (eval mode)."""
    emb_initial = params['emb_e'][X]
    si, ti = bn_scale_shift(params['bn_init'])
    e1_embedded_all = emb_initial * si + ti
    stacked = jnp.concatenate([e1_embedded_all[e1], params['emb_rel'][rel]], 1)
    s0, t0 = bn_scale_shift(params['bn0'])
    x = stacked * s0[None, :, None] + t0[None, :, None]
    y = jax.lax.conv_general_dilated(
        x, params['conv_w'], window_strides=(1,), padding=[(PAD, PAD)],
        dimension_numbers=('NCH', 'OIH', 'NCH'), precision=HIGHEST)
    y = y + params['conv_b'][None, :, None]
    s1, t1 = bn_scale_shift(params['bn1'])
    y = jnp.maximum(y * s1[None, :, None] + t1[None, :, None], 0.0)
    y = y.reshape(B, CD)
    y = jnp.dot(y, params['fc_w'].T, precision=HIGHEST) + params['fc_b']
    s2, t2 = bn_scale_shift(params['bn2'])
    y = jnp.maximum(y * s2 + t2, 0.0)
    return jax.nn.sigmoid(jnp.dot(y, e1_embedded_all.T, precision=HIGHEST))


if __name__ == "__main__":
    params = init_params(jax.random.PRNGKey(0))
    k1, k2 = jax.random.split(jax.random.PRNGKey(1))
    e1 = jax.random.randint(k1, (B, 1), 0, E, dtype=jnp.int32)
    rel = jax.random.randint(k2, (B, 1), 0, R, dtype=jnp.int32)
    X = jnp.arange(E, dtype=jnp.int32)

    prep = prepare_model(params, X)            # hoisted, params-only preprocessing
    pred = conv_transe_forward(prep, e1, rel)
    pred = jax.block_until_ready(pred)

    ref = reference_forward(params, e1, rel, X)
    assert pred.shape == (B, E) and pred.dtype == jnp.bfloat16
    # bf16 MXU operands + bf16 output vs f32 HIGHEST reference: agree to ~5e-3.
    np.testing.assert_allclose(np.asarray(pred.astype(jnp.float32)), np.asarray(ref),
                               atol=1e-2, rtol=1e-2)
    print("KERNEL_OK")
</pallas_src>

<mosaic_0001>
module attributes {stable_mosaic.version = 11 : i64} {
  func.func @convtranse_kernel(%arg0: i32, %arg1: i32, %arg2: memref<16x128xbf16, #tpu.memory_space<vmem>>, %arg3: memref<128x256xbf16, #tpu.memory_space<vmem>>, %arg4: memref<1x256xf32, #tpu.memory_space<vmem>>, %arg5: memref<256x128xbf16, #tpu.memory_space<vmem>>, %arg6: memref<1x128xf32, #tpu.memory_space<vmem>>, %arg7: memref<128x128xbf16, #tpu.memory_space<vmem>>, %arg8: memref<16x128xbf16, #tpu.memory_space<vmem>>) attributes {dimension_semantics = [#tpu.dimension_semantics<parallel>, #tpu.dimension_semantics<parallel>], iteration_bounds = array<i64: 1, 1>, scalar_prefetch = 0 : i64, scratch_operands = 0 : i64, tpu.core_type = #tpu.core_type<tc>, window_params = [{transform_indices = @transform_0, window_bounds = array<i64: 16, 128>}, {pipeline_mode = #tpu.pipeline_mode<synchronous>, transform_indices = @transform_1, window_bounds = array<i64: 128, 256>}, {pipeline_mode = #tpu.pipeline_mode<synchronous>, transform_indices = @transform_2, window_bounds = array<i64: 1, 256>}, {pipeline_mode = #tpu.pipeline_mode<synchronous>, transform_indices = @transform_3, window_bounds = array<i64: 256, 128>}, {pipeline_mode = #tpu.pipeline_mode<synchronous>, transform_indices = @transform_4, window_bounds = array<i64: 1, 128>}, {transform_indices = @transform_5, window_bounds = array<i64: 128, 128>}, {transform_indices = @transform_6, window_bounds = array<i64: 16, 128>}]} {
    %c0 = arith.constant 0 : index
    %c0_0 = arith.constant 0 : index
    %0 = vector.load %arg2[%c0, %c0_0] : memref<16x128xbf16, #tpu.memory_space<vmem>>, vector<16x128xbf16>
    %c0_1 = arith.constant 0 : index
    %c0_2 = arith.constant 0 : index
    %1 = vector.load %arg3[%c0_1, %c0_2] : memref<128x256xbf16, #tpu.memory_space<vmem>>, vector<128x256xbf16>
    %cst = arith.constant dense<0.000000e+00> : vector<16x256xf32>
    %2 = tpu.matmul %0, %1, %cst {dimension_numbers = #tpu.dot_dimension_numbers<[1], [0], [0], [1], [0, 0, 1, 1], [], []>} : vector<16x128xbf16>, vector<128x256xbf16>, vector<16x256xf32> -> vector<16x256xf32>
    %c0_3 = arith.constant 0 : index
    %c0_4 = arith.constant 0 : index
    %3 = vector.load %arg4[%c0_3, %c0_4] : memref<1x256xf32, #tpu.memory_space<vmem>>, vector<1x256xf32>
    %4 = vector.broadcast %3 : vector<1x256xf32> to vector<16x256xf32>
    %5 = arith.addf %2, %4 : vector<16x256xf32>
    %cst_5 = arith.constant 0.000000e+00 : f32
    %6 = vector.broadcast %cst_5 : f32 to vector<16x256xf32>
    %7 = arith.maximumf %5, %6 : vector<16x256xf32>
    %8 = arith.truncf %7 : vector<16x256xf32> to vector<16x256xbf16>
    %c0_6 = arith.constant 0 : index
    %c0_7 = arith.constant 0 : index
    %9 = vector.load %arg5[%c0_6, %c0_7] : memref<256x128xbf16, #tpu.memory_space<vmem>>, vector<256x128xbf16>
    %cst_8 = arith.constant dense<0.000000e+00> : vector<16x128xf32>
    %10 = tpu.matmul %8, %9, %cst_8 {dimension_numbers = #tpu.dot_dimension_numbers<[1], [0], [0], [1], [0, 0, 1, 1], [], []>} : vector<16x256xbf16>, vector<256x128xbf16>, vector<16x128xf32> -> vector<16x128xf32>
    %c0_9 = arith.constant 0 : index
    %c0_10 = arith.constant 0 : index
    %11 = vector.load %arg6[%c0_9, %c0_10] : memref<1x128xf32, #tpu.memory_space<vmem>>, vector<1x128xf32>
    %12 = vector.broadcast %11 : vector<1x128xf32> to vector<16x128xf32>
    %13 = arith.addf %10, %12 : vector<16x128xf32>
    %cst_11 = arith.constant 0.000000e+00 : f32
    %14 = vector.broadcast %cst_11 : f32 to vector<16x128xf32>
    %15 = arith.maximumf %13, %14 : vector<16x128xf32>
    %16 = arith.truncf %15 : vector<16x128xf32> to vector<16x128xbf16>
    %c0_12 = arith.constant 0 : index
    %c0_13 = arith.constant 0 : index
    %17 = vector.load %arg7[%c0_12, %c0_13] : memref<128x128xbf16, #tpu.memory_space<vmem>>, vector<128x128xbf16>
    %cst_14 = arith.constant dense<0.000000e+00> : vector<16x128xf32>
    %18 = tpu.matmul %16, %17, %cst_14 {dimension_numbers = #tpu.dot_dimension_numbers<[1], [1], [0], [0], [0, 0, 1, 0], [], []>} : vector<16x128xbf16>, vector<128x128xbf16>, vector<16x128xf32> -> vector<16x128xf32>
    %cst_15 = arith.constant 5.000000e-01 : f32
    %19 = vector.broadcast %cst_15 : f32 to vector<16x128xf32>
    %20 = arith.mulf %19, %18 : vector<16x128xf32>
    %21 = math.tanh %20 : vector<16x128xf32>
    %cst_16 = arith.constant 5.000000e-01 : f32
    %22 = vector.broadcast %cst_16 : f32 to vector<16x128xf32>
    %23 = arith.mulf %22, %21 : vector<16x128xf32>
    %cst_17 = arith.constant 5.000000e-01 : f32
    %24 = vector.broadcast %cst_17 : f32 to vector<16x128xf32>
    %25 = arith.addf %23, %24 : vector<16x128xf32>
    %26 = arith.truncf %25 : vector<16x128xf32> to vector<16x128xbf16>
    %c0_18 = arith.constant 0 : index
    %c0_19 = arith.constant 0 : index
    %27 = vector.load %arg8[%c0_18, %c0_19] : memref<16x128xbf16, #tpu.memory_space<vmem>>, vector<16x128xbf16>
    tpu.vector_store %arg8[%c0_18, %c0_19], %26 {strides = array<i32>} : memref<16x128xbf16, #tpu.memory_space<vmem>>, vector<16x128xbf16>,
    return
  }
  func.func @transform_0(%arg0: i32, %arg1: i32) -> (i32, i32) {
    %c0_i32 = arith.constant 0 : i32
    %c0_i32_0 = arith.constant 0 : i32
    return %arg0, %c0_i32 : i32, i32
  }
  func.func @transform_1(%arg0: i32, %arg1: i32) -> (i32, i32) {
    %c0_i32 = arith.constant 0 : i32
    %c0_i32_0 = arith.constant 0 : i32
    %c0_i32_1 = arith.constant 0 : i32
    return %c0_i32, %c0_i32_0 : i32, i32
  }
  func.func @transform_2(%arg0: i32, %arg1: i32) -> (i32, i32) {
    %c0_i32 = arith.constant 0 : i32
    %c0_i32_0 = arith.constant 0 : i32
    %c0_i32_1 = arith.constant 0 : i32
    return %c0_i32, %c0_i32_0 : i32, i32
  }
  func.func @transform_3(%arg0: i32, %arg1: i32) -> (i32, i32) {
    %c0_i32 = arith.constant 0 : i32
    %c0_i32_0 = arith.constant 0 : i32
    %c0_i32_1 = arith.constant 0 : i32
    return %c0_i32, %c0_i32_0 : i32, i32
  }
  func.func @transform_4(%arg0: i32, %arg1: i32) -> (i32, i32) {
    %c0_i32 = arith.constant 0 : i32
    %c0_i32_0 = arith.constant 0 : i32
    %c0_i32_1 = arith.constant 0 : i32
    return %c0_i32, %c0_i32_0 : i32, i32
  }
  func.func @transform_5(%arg0: i32, %arg1: i32) -> (i32, i32) {
    %c0_i32 = arith.constant 0 : i32
    %c0_i32_0 = arith.constant 0 : i32
    return %arg1, %c0_i32 : i32, i32
  }
  func.func @transform_6(%arg0: i32, %arg1: i32) -> (i32, i32) {
    %c0_i32 = arith.constant 0 : i32
    return %arg0, %arg1 : i32, i32
  }
}

</mosaic_0001>

<bundles_post_ra>
// kernel: tpu_custom_call.1
= control target key start
LH: loop header
LB: loop body
LE: loop exit
PB: predicated region body
PF: predicated region fallthrough
CT: control target
= control target key end

     0   :  { %11 = vsyncpa [#allocation3], 0  ;;  %s983_s0 = inlined_call_operand.hbm [shape: bf16[16,128], index: 0, kind: input, shape index: {}]   ;;  %s984_s1 = inlined_call_operand.hbm [shape: bf16[128,256], index: 1, kind: input, shape index: {}]   ;;  %s985_s2 = inlined_call_operand.vmem [shape: f32[1,256], index: 2, kind: input, shape index: {}]   ;;  %s986_s3 = inlined_call_operand.hbm [shape: bf16[256,128], index: 3, kind: input, shape index: {}]   ;;  %s987_s4 = inlined_call_operand.vmem [shape: f32[1,128], index: 4, kind: input, shape index: {}]   ;;  %s988_s5 = inlined_call_operand.hbm [shape: bf16[128,128], index: 5, kind: input, shape index: {}]   ;;  %s989_s6 = inlined_call_operand.hbm [shape: bf16[16,128], index: 6, kind: output, shape index: {}]  }
   0x1   :  { %12 = vsyncpa [#allocation6], 0 }
   0x2   :  { %13 = vsyncpa [#allocation9], 0 }
   0x3   :  { %14 = vsyncpa [#allocation4], 0  ;;  %s851_s21 = smov [#allocation5]   ;;  %s733_s25 = scalar_lea.hbm %s984_s1, 2048 }
   0x4   :  { %s32_s22 = sshll.u32 %s851_s21, 4  ;;  %p734_p0 = scmp.ne.s32.totalorder %s984_s1, %s733_s25  ;;  %s33_s22 = int_to_ptr.vmem [resolvable:$true] %s32_s22 }
   0x5   :  { %p737_p1 = scmp.lt.u32.totalorder %s733_s25, %s984_s1 }
   0x7   :  { %p739_p2 = pnand %p737_p1, %p734_p0 }
   0x9   :  { %742 = shalt.err (!%p739_p2)
}
   0xa   :  { %s743_s30 = scalar_lea.vmem %s33_s22, 2048  ;;  %p748_p4 = scmp.lt.s32.totalorder %s33_s22, %s33_s22 }
   0xb   :  { %p744_p3 = scmp.ne.s32.totalorder %s33_s22, %s743_s30  ;;  %p749_p5 = scmp.lt.s32.totalorder %s743_s30, %s743_s30 }
   0xd   :  { %p750_p6 = por %p749_p5, %p748_p4 }
   0xf   :  { %p751_p7 = pnand %p750_p6, %p744_p3 }
  0x11   :  { %754 = shalt.err (!%p751_p7)
}
  0x12   :  { %s852_s7 = smov 128   ;;  %s853_s8 = smov 8  }
  0x13   :  { %38 = dma.hbm_to_vmem [thread:$0]  %s984_s1, 2048, %s33_s22, [#allocation6], %s852_s7, %s852_s7, %s853_s8  }
  0x14   :  { %s854_s11 = smov [#allocation2]   ;;  %s755_s15 = scalar_lea.hbm %s983_s0, 128 }
  0x15   :  { %s20_s12 = sshll.u32 %s854_s11, 4  ;;  %p756_p8 = scmp.ne.s32.totalorder %s983_s0, %s755_s15  ;;  %s21_s12 = int_to_ptr.vmem [resolvable:$true] %s20_s12 }
  0x16   :  { %p759_p9 = scmp.lt.u32.totalorder %s755_s15, %s983_s0 }
  0x18   :  { %p761_p10 = pnand %p759_p9, %p756_p8 }
  0x1a   :  { %764 = shalt.err (!%p761_p10)
}
  0x1b   :  { %s765_s20 = scalar_lea.vmem %s21_s12, 128  ;;  %p770_p12 = scmp.lt.s32.totalorder %s21_s12, %s21_s12 }
  0x1c   :  { %p766_p11 = scmp.ne.s32.totalorder %s21_s12, %s765_s20  ;;  %p771_p13 = scmp.lt.s32.totalorder %s765_s20, %s765_s20 }
  0x1e   :  { %p772_p0 = por %p771_p13, %p770_p12 }
  0x20   :  { %p773_p1 = pnand %p772_p0, %p766_p11 }
  0x22   :  { %776 = shalt.err (!%p773_p1)
}
  0x23   :  { %s855_s1 = smov 64   ;;  %s856_s21 = smov 4  }
  0x24   :  { %26 = dma.hbm_to_vmem [thread:$0]  %s983_s0, 128, %s21_s12, [#allocation3], %s855_s1, %s855_s1, %s856_s21  }
  0x25   :  { %s857_s24 = smov [#allocation7]   ;;  %s858_s26 = smov [#allocation8]  }
  0x26   :  { %s46_s25 = sshll.u32 %s857_s24, 4  ;;  %s60_s27 = sshll.u32 %s858_s26, 4  ;;  %s47_s25 = int_to_ptr.vmem [resolvable:$true] %s46_s25  ;;  %s925_s27 = int_to_ptr.vmem [resolvable:$true] %s60_s27 }
  0x27   :  { %s777_s30 = scalar_lea.hbm %s986_s3, 2048 }
  0x28   :  { %p778_p2 = scmp.ne.s32.totalorder %s986_s3, %s777_s30  ;;  %p781_p3 = scmp.lt.u32.totalorder %s777_s30, %s986_s3 }
  0x2a   :  { %p783_p4 = pnand %p781_p3, %p778_p2 }
  0x2c   :  { %786 = shalt.err (!%p783_p4)
}
  0x2d   :  { %s787_s0 = scalar_lea.vmem %s47_s25, 2048  ;;  %p792_p6 = scmp.lt.s32.totalorder %s47_s25, %s47_s25 }
  0x2e   :  { %p788_p5 = scmp.ne.s32.totalorder %s47_s25, %s787_s0  ;;  %p793_p7 = scmp.lt.s32.totalorder %s787_s0, %s787_s0 }
  0x30   :  { %p794_p8 = por %p793_p7, %p792_p6 }
  0x32   :  { %p795_p9 = pnand %p794_p8, %p788_p5 }
  0x34   :  { %798 = shalt.err (!%p795_p9)
}
  0x35   :  { %52 = dma.hbm_to_vmem [thread:$0]  %s986_s3, 2048, %s47_s25, [#allocation6], %s855_s1, %s855_s1, %s856_s21  }
  0x36   :  { %s799_s15 = scalar_lea.hbm %s988_s5, 1024 }
  0x37   :  { %p800_p10 = scmp.ne.s32.totalorder %s988_s5, %s799_s15  ;;  %p803_p11 = scmp.lt.u32.totalorder %s799_s15, %s988_s5 }
  0x39   :  { %p805_p12 = pnand %p803_p11, %p800_p10 }
  0x3b   :  { %808 = shalt.err (!%p805_p12)
}
  0x3c   :  { %s809_s20 = scalar_lea.vmem %s925_s27, 1024  ;;  %p814_p0 = scmp.lt.s32.totalorder %s925_s27, %s925_s27 }
  0x3d   :  { %p810_p13 = scmp.ne.s32.totalorder %s925_s27, %s809_s20  ;;  %p815_p1 = scmp.lt.s32.totalorder %s809_s20, %s809_s20 }
  0x3f   :  { %p816_p2 = por %p815_p1, %p814_p0 }
  0x41   :  { %p817_p3 = pnand %p816_p2, %p810_p13 }
  0x43   :  { %820 = shalt.err (!%p817_p3)
}
  0x44   :  { %66 = dma.hbm_to_vmem [thread:$0]  %s988_s5, 1024, %s925_s27, [#allocation9], %s855_s1, %s855_s1, %s856_s21  }
  0x45   :  { %843 = dma.done.wait [#allocation3], 128  }
  0x46   :  { %844 = vsyncadd [#allocation3], 4294967168 }
  0x47   :  { %845 = dma.done.wait [#allocation6], 4096  }
  0x48   :  { %846 = vsyncadd [#allocation6], 4294963200 }
  0x49   :  { %847 = dma.done.wait [#allocation9], 1024  }
  0x4a   :  { %848 = vsyncadd [#allocation9], 4294966272  ;;  %v859_v0 = vmov 0   ;;  %v680_v1 = vld [vmem:[#allocation5 + $0x4] ss:$8 sps:$4 sm:$0xff]   ;;  %v704_v18 = vld [vmem:[#allocation2] sm:$0xff]   ;;  %v100_v42 = vlaneseq }
  0x4b   :  { %228 = vmatprep.mubr.bf16.mxu1 %v859_v0  ;;  %v682_v2 = vld [vmem:[#allocation5] ss:$8 sps:$4 sm:$0xff]   ;;  %196 = vmatprep.subr.bf16.mxu1 %v680_v1  ;;  %v683_v3 = vld [vmem:[#allocation5 + $0x14] ss:$8 sps:$4 sm:$0xff]   ;;  %v685_v4 = vld [vmem:[#allocation5 + $0x10] ss:$8 sps:$4 sm:$0xff]  }
  0x4c   :  { %197 = vmatpush1.bf16.msra.mxu1 %v682_v2  ;;  %v686_v5 = vld [vmem:[#allocation5 + $0x24] ss:$8 sps:$4 sm:$0xff]   ;;  %v688_v6 = vld [vmem:[#allocation5 + $0x20] ss:$8 sps:$4 sm:$0xff]   ;;  %v689_v7 = vld [vmem:[#allocation5 + $0x34] ss:$8 sps:$4 sm:$0xff]  }
  0x4d   :  { %198 = vmatprep.subr.bf16.mxu1 %v683_v3  ;;  %v691_v8 = vld [vmem:[#allocation5 + $0x30] ss:$8 sps:$4 sm:$0xff]   ;;  %v692_v9 = vld [vmem:[#allocation5 + $0x44] ss:$8 sps:$4 sm:$0xff]   ;;  %v694_v10 = vld [vmem:[#allocation5 + $0x40] ss:$8 sps:$4 sm:$0xff]  }
  0x4e   :  { %v695_v11 = vld [vmem:[#allocation5 + $0x54] ss:$8 sps:$4 sm:$0xff]   ;;  %v697_v12 = vld [vmem:[#allocation5 + $0x50] ss:$8 sps:$4 sm:$0xff]   ;;  %v698_v13 = vld [vmem:[#allocation5 + $0x64] ss:$8 sps:$4 sm:$0xff]  }
  0x4f   :  { %v700_v14 = vld [vmem:[#allocation5 + $0x60] ss:$8 sps:$4 sm:$0xff]   ;;  %v701_v15 = vld [vmem:[#allocation5 + $0x74] ss:$8 sps:$4 sm:$0xff]   ;;  %v703_v16 = vld [vmem:[#allocation5 + $0x70] ss:$8 sps:$4 sm:$0xff]  }
  0x50   :  { %199 = vmatpush1.bf16.msra.mxu1 %v685_v4  ;;  %v705_v17 = vld [vmem:[#allocation7 + $0x40] sm:$0xff]   ;;  %v707_v20 = vld [vmem:[#allocation7 + $0x48] sm:$0xff]   ;;  %v709_v22 = vld [vmem:[#allocation7 + $0x50] sm:$0xff]   ;;  %v860_v35 = vmov 0.0   ;;  %v101_v43 = vshrl.u32 %v100_v42, 7  ;;  %vm861_vm0 = vmmov 0  }
  0x51   :  { %200 = vmatprep.subr.bf16.mxu1 %v686_v5  ;;  %v706_v19 = vld [vmem:[#allocation7] sm:$0xff]   ;;  %v708_v21 = vld [vmem:[#allocation7 + $0x8] sm:$0xff]   ;;  %v710_v23 = vld [vmem:[#allocation7 + $0x10] sm:$0xff]   ;;  %648 = vmatprep.subr.bf16.mxu0 %v860_v35 }
  0x52   :  { %v711_v24 = vld [vmem:[#allocation7 + $0x58] sm:$0xff]   ;;  %v713_v26 = vld [vmem:[#allocation7 + $0x60] sm:$0xff]   ;;  %v715_v28 = vld [vmem:[#allocation7 + $0x68] sm:$0xff]   ;;  %v102_v44 = vsub.s32 0, %v101_v43  ;;  %v106_v46 = vsub.s32 1, %v101_v43  ;;  %664 = vmatprep.mubr.msk.bf16.mxu0 %vm861_vm0, %v860_v35 }
  0x53   :  { %v712_v25 = vld [vmem:[#allocation7 + $0x18] sm:$0xff]   ;;  %v714_v27 = vld [vmem:[#allocation7 + $0x20] sm:$0xff]   ;;  %v716_v29 = vld [vmem:[#allocation7 + $0x28] sm:$0xff]  }
  0x54   :  { %201 = vmatpush1.bf16.msra.mxu1 %v688_v6  ;;  %v717_v30 = vld [vmem:[#allocation7 + $0x70] sm:$0xff]   ;;  %v719_v32 = vld [vmem:[#allocation7 + $0x78] sm:$0xff]   ;;  %v721_v34 = vld [vmem:[#allocation8] sm:$0xff]  }
  0x55   :  { %202 = vmatprep.subr.bf16.mxu1 %v689_v7  ;;  %v718_v31 = vld [vmem:[#allocation7 + $0x30] sm:$0xff]   ;;  %v720_v33 = vld [vmem:[#allocation7 + $0x38] sm:$0xff]   ;;  %649 = vmatpush3.bf16.xpose.msra.mxu0 %v721_v34  ;;  %v722_v36 = vld [vmem:[#allocation8 + $0x8] sm:$0xff]  }
  0x56   :  { %650 = vmatprep.subr.bf16.mxu0 %v860_v35  ;;  %v723_v37 = vld [vmem:[#allocation8 + $0x10] sm:$0xff]   ;;  %v724_v38 = vld [vmem:[#allocation8 + $0x18] sm:$0xff]   ;;  %v725_v39 = vld [vmem:[#allocation8 + $0x20] sm:$0xff]  }
  0x57   :  { %v726_v40 = vld [vmem:[#allocation8 + $0x28] sm:$0xff]   ;;  %v727_v41 = vld [vmem:[#allocation8 + $0x30] sm:$0xff]   ;;  %v98_v45 = vld [vmem:[%s985_s2] sm:$0x3] }
  0x58   :  { %203 = vmatpush1.bf16.msra.mxu1 %v691_v8  ;;  %v103_v47 = vrot.slane %v98_v45, %v102_v44  ;;  %v107_v48 = vrot.slane %v98_v45, %v106_v46  ;;  %v728_v63 = vld [vmem:[#allocation8 + $0x38] sm:$0xff]  }
  0x59   :  { %204 = vmatprep.subr.bf16.mxu1 %v692_v9  ;;  %v583_v1 = vld [vmem:[%s987_s4] ss:$0 sm:$0xff]  ;;  %s862_s4 = smov [#allocation10]  }
  0x5a   :  { %s552_s25 = sshll.u32 %s862_s4, 4  ;;  %s553_s25 = int_to_ptr.vmem [resolvable:$true] %s552_s25 }
  0x5b   :  { %s821_s26 = scalar_lea.vmem %s553_s25, 128  ;;  %p826_p5 = scmp.lt.s32.totalorder %s553_s25, %s553_s25 }
  0x5c   :  { %205 = vmatpush1.bf16.msra.mxu1 %v694_v10  ;;  %p822_p4 = scmp.ne.s32.totalorder %s553_s25, %s821_s26  ;;  %p827_p6 = scmp.lt.s32.totalorder %s821_s26, %s821_s26 }
  0x5d   :  { %206 = vmatprep.subr.bf16.mxu1 %v695_v11  ;;  %651 = vmatpush3.bf16.xpose.msra.mxu0 %v722_v36 }
  0x5e   :  { %652 = vmatprep.subr.bf16.mxu0 %v860_v35  ;;  %p828_p7 = por %p827_p6, %p826_p5 }
  0x60   :  { %207 = vmatpush1.bf16.msra.mxu1 %v697_v12  ;;  %p829_p8 = pnand %p828_p7, %p822_p4 }
  0x61   :  { %208 = vmatprep.subr.bf16.mxu1 %v698_v13 }
  0x64   :  { %209 = vmatpush1.bf16.msra.mxu1 %v700_v14 }
  0x65   :  { %210 = vmatprep.subr.bf16.mxu1 %v701_v15  ;;  %653 = vmatpush3.bf16.xpose.msra.mxu0 %v723_v37 }
  0x66   :  { %654 = vmatprep.subr.bf16.mxu0 %v860_v35 }
  0x68   :  { %211 = vmatpush1.bf16.msra.mxu1 %v703_v16 }
  0x69   :  { %617 = vmatprep.subr.bf16.mxu1 %v705_v17 }
  0x6b   :  { %229 = vmatmul.mubr.bf16.vlgmr.msra.gmra.mrb[0].mxu1 %v704_v18 }
  0x6c   :  { %618 = vmatpush3.bf16.msra.mxu1 %v706_v19 }
  0x6d   :  { %619 = vmatprep.subr.bf16.mxu1 %v707_v20  ;;  %655 = vmatpush3.bf16.xpose.msra.mxu0 %v724_v38 }
  0x6e   :  { %656 = vmatprep.subr.bf16.mxu0 %v860_v35 }
  0x70   :  { %620 = vmatpush3.bf16.msra.mxu1 %v708_v21 }
  0x71   :  { %621 = vmatprep.subr.bf16.mxu1 %v709_v22 }
  0x74   :  { %622 = vmatpush3.bf16.msra.mxu1 %v710_v23 }
  0x75   :  { %623 = vmatprep.subr.bf16.mxu1 %v711_v24  ;;  %657 = vmatpush3.bf16.xpose.msra.mxu0 %v725_v39 }
  0x76   :  { %658 = vmatprep.subr.bf16.mxu0 %v860_v35 }
  0x78   :  { %624 = vmatpush3.bf16.msra.mxu1 %v712_v25 }
  0x79   :  { %625 = vmatprep.subr.bf16.mxu1 %v713_v26 }
  0x7c   :  { %626 = vmatpush3.bf16.msra.mxu1 %v714_v27 }
  0x7d   :  { %627 = vmatprep.subr.bf16.mxu1 %v715_v28  ;;  %659 = vmatpush3.bf16.xpose.msra.mxu0 %v726_v40 }
  0x7e   :  { %660 = vmatprep.subr.bf16.mxu0 %v860_v35 }
  0x80   :  { %628 = vmatpush3.bf16.msra.mxu1 %v716_v29 }
  0x81   :  { %629 = vmatprep.subr.bf16.mxu1 %v717_v30 }
  0x84   :  { %630 = vmatpush3.bf16.msra.mxu1 %v718_v31 }
  0x85   :  { %631 = vmatprep.subr.bf16.mxu1 %v719_v32  ;;  %661 = vmatpush3.bf16.xpose.msra.mxu0 %v727_v41 }
  0x86   :  { %662 = vmatprep.subr.bf16.mxu0 %v860_v35 }
  0x88   :  { %632 = vmatpush3.bf16.msra.mxu1 %v720_v33 }
  0x8d   :  { %663 = vmatpush3.bf16.xpose.msra.mxu0 %v728_v63 }
 0x13e   :  { %v230_v49 = vpop.f32.mrb[0].mxu1 }
 0x13f   :  { %v231_v50 = vadd.f32 %v230_v49, %v103_v47  ;;  %v232_v51 = vpop.f32.mrb[1].mxu1 }
 0x140   :  { %v233_v52 = vadd.f32 %v232_v51, %v107_v48  ;;  %v234_v53 = vpop.f32.mrb[2].mxu1 }
 0x141   :  { %v235_v54 = vadd.f32 %v234_v53, %v103_v47  ;;  %v236_v55 = vpop.f32.mrb[3].mxu1  ;;  %v239_v57 = vmax.f32 %v231_v50, 0.0 }
 0x142   :  { %v237_v56 = vadd.f32 %v236_v55, %v107_v48  ;;  %v240_v59 = vmax.f32 %v233_v52, 0.0 }
 0x143   :  { %v241_v58 = vmax.f32 %v235_v54, 0.0 }
 0x144   :  { %v242_v60 = vmax.f32 %v237_v56, 0.0 }
 0x145   :  { %v243_v61 = vpack.c.bf16 %v241_v58, %v239_v57 }
 0x146   :  { %v244_v62 = vpack.c.bf16 %v242_v60, %v240_v59 }
 0x148   :  { %412 = vmatprep.mubr.bf16.mxu1 %v244_v62 }
 0x149   :  { %413 = vmatmul.mubr.bf16.vlgmr.msra.gmra.mrb[4].mxu1 %v243_v61 }
 0x21c   :  { %v633_v0 = vpop.f32.mrb[4].mxu1 }
 0x21d   :  { %v634_v2 = vpop.f32.mrb[5].mxu1 }
 0x21e   :  { %v635_v3 = vadd.f32 %v634_v2, %v633_v0  ;;  %v636_v4 = vpop.f32.mrb[6].mxu1 }
 0x21f   :  { %v637_v5 = vpop.f32.mrb[7].mxu1 }
 0x220   :  { %v415_v6 = vadd.f32 %v635_v3, %v583_v1  ;;  %v638_v7 = vadd.f32 %v637_v5, %v636_v4 }
 0x222   :  { %v418_v8 = vadd.f32 %v638_v7, %v583_v1  ;;  %v421_v9 = vmax.f32 %v415_v6, 0.0 }
 0x224   :  { %v422_v10 = vmax.f32 %v418_v8, 0.0 }
 0x226   :  { %v423_v11 = vpack.c.bf16 %v422_v10, %v421_v9 }
 0x228   :  { %665 = vmatmul.mubr.bf16.vlgmr.msra.gmra.mrb[0].mxu0 %v423_v11 }
 0x2fb   :  { %v522_v12 = vpop.f32.mrb[0].mxu0 }
 0x2fc   :  { %v529_v13 = vmul.f32 0.5, %v522_v12  ;;  %v666_v14 = vpop.f32.mrb[1].mxu0 }
 0x2fd   :  { %v525_v15 = vpop.f32.mrb[2].mxu0 }
 0x2fe   :  { %729 = vtanh.f32 %v529_v13  ;;  %v530_v16 = vmul.f32 0.5, %v525_v15  ;;  %v667_v17 = vpop.f32.mrb[3].mxu0 }
 0x300   :  { %731 = vtanh.f32 %v530_v16 }
 0x308   :  { %v730_v18 = vpop.eup %729 }
 0x309   :  { %v533_v19 = vmul.f32 0.5, %v730_v18 }
 0x30a   :  { %v732_v20 = vpop.eup %731 }
 0x30b   :  { %v534_v21 = vmul.f32 0.5, %v732_v20  ;;  %v535_v22 = vadd.f32 0.5, %v533_v19 }
 0x30d   :  { %v536_v23 = vadd.f32 0.5, %v534_v21 }
 0x30f   :  { %v615_v24 = vpack.c.bf16 %v536_v23, %v535_v22 }
 0x311   :  { %616 = vst [vmem:[#allocation10] sm:$0xff] %v615_v24  }
 0x312   :  { %832 = shalt.err (!%p829_p8)
}
 0x313   :  { %s833_s29 = scalar_lea.hbm %s989_s6, 128 }
 0x314   :  { %p834_p9 = scmp.ne.s32.totalorder %s989_s6, %s833_s29  ;;  %p837_p10 = scmp.lt.u32.totalorder %s833_s29, %s989_s6 }
 0x316   :  { %p839_p11 = pnand %p837_p10, %p834_p9 }
 0x318   :  { %842 = shalt.err (!%p839_p11)
}
 0x319   :  { %558 = dma.vmem_to_hbm [thread:$0]  %s553_s25, 128, %s989_s6, [#allocation4], %s855_s1, %s855_s1, %s856_s21  }
 0x31a   :  { %849 = dma.done.wait [#allocation4], 128  }
 0x31b   :  { %850 = vsyncadd [#allocation4], 4294967168 }
 0x31c   :  { %562 = vsyncpa [#allocation3], 1 }
 0x31d   :  { %563 = vsyncpa [#allocation6], 1 }
 0x31e   :  { %564 = vsyncpa [#allocation9], 1 }
 0x31f   :  { %565 = vsyncpa [#allocation4], 1 }

</bundles_post_ra>
